<compile_context>
chip_gen: v5e
topology: v5e:2x2
jax: 0.10.0
libtpu: 0.0.40
codegen_flags: <defaults>
</compile_context>

<pallas_src>
import functools

import jax
import jax.numpy as jnp
from jax.experimental import pallas as pl
from jax.experimental.pallas import tpu as pltpu

_LANES = 128
_SUBLANES = 8


def _irt_kernel(x_ref, o_ref):
    # x_ref: (3, tile_rows, 128) VMEM tile whose planes are [z, a, b].
    # o_ref: (tile_rows, 128).
    z = x_ref[0]
    a = x_ref[1]
    b = x_ref[2]
    # p = 1 / (1 + exp(-a*(z-b)))  ==  sigmoid(a*(z-b))   (3 VPU ops + 1 EUP)
    o_ref[...] = jax.nn.sigmoid(a * (z - b))


def _irtnet_planes(x3d, *, num_tiles, tile_rows):
    """Run the kernel on a lane-dense (3, num_tiles*tile_rows, 128) slab."""
    rows_padded = num_tiles * tile_rows
    return pl.pallas_call(
        _irt_kernel,
        out_shape=jax.ShapeDtypeStruct((rows_padded, _LANES), jnp.float32),
        grid_spec=pltpu.PrefetchScalarGridSpec(
            num_scalar_prefetch=0,
            grid=(num_tiles,),
            in_specs=[pl.BlockSpec((3, tile_rows, _LANES), lambda i: (0, i, 0))],
            out_specs=pl.BlockSpec((tile_rows, _LANES), lambda i: (i, 0)),
        ),
        compiler_params=pltpu.CompilerParams(
            dimension_semantics=("parallel",),
            # 4096-row blocks double-buffered = ~16 MiB; raise the cap above
            # v5e's 16 MiB scoped default, stay under v7x's 64 MiB physical.
            vmem_limit_bytes=48 * 1024 * 1024,
        ),
    )(x3d)


def _tiling(rows, max_tile_rows):
    """Balanced tiling: equal blocks, <=7 padded rows per block; force >=2/>=4
    grid steps for large inputs so both v7x TensorCores get work."""
    num_tiles = pl.cdiv(rows, max_tile_rows)
    if rows >= 1024:
        num_tiles = max(num_tiles, 4)
    elif rows >= 256:
        num_tiles = max(num_tiles, 2)
    tile_rows = pl.cdiv(rows, num_tiles)
    tile_rows = ((tile_rows + _SUBLANES - 1) // _SUBLANES) * _SUBLANES
    return num_tiles, tile_rows


@functools.partial(jax.jit, static_argnames=("max_tile_rows",))
def irtnet_forward(x, *, max_tile_rows=4096):
    """IRTNet forward. x: (N, 3) array whose columns are [z, a, b]. Returns (N,)."""
    assert x.ndim == 2 and x.shape[1] == 3, "expected x of shape (N, 3)"
    n = x.shape[0]

    rows = pl.cdiv(n, _LANES)                     # full 128-lane rows
    num_tiles, tile_rows = _tiling(rows, max_tile_rows)
    rows_padded = num_tiles * tile_rows
    n_padded = rows_padded * _LANES

    # Layout glue: (N, 3) -> lane-dense (3, rows_padded, 128). Under jit the
    # transpose + pad + reshape fuse into a single copy pass.
    x_t = jnp.transpose(x, (1, 0)).astype(jnp.float32)          # (3, N)
    if n_padded != n:
        x_t = jnp.pad(x_t, ((0, 0), (0, n_padded - n)))
    x3d = x_t.reshape(3, rows_padded, _LANES)

    out2d = _irtnet_planes(x3d, num_tiles=num_tiles, tile_rows=tile_rows)

    out = out2d.reshape(n_padded)                 # free (bitcast)
    if n_padded != n:
        out = out[:n]                             # only slice when padded
    return out


if __name__ == "__main__":
    # IRTNet has no learnable parameters; input rows are [z, a, b].
    key = jax.random.PRNGKey(0)
    N = 256
    x = jax.random.normal(key, (N, 3), dtype=jnp.float32)

    p = jax.block_until_ready(irtnet_forward(x))

    # Reference check (plain JAX, matching the PyTorch formula).
    z, a, b = x[:, 0], x[:, 1], x[:, 2]
    p_ref = 1.0 / (1.0 + jnp.exp(-a * (z - b)))
    assert p.shape == (N,)
    assert jnp.allclose(p, p_ref, atol=1e-6, rtol=1e-5), float(
        jnp.max(jnp.abs(p - p_ref))
    )

    # Also exercise a non-multiple-of-128 batch to confirm tail handling.
    N2 = 1000
    x2 = jax.random.normal(jax.random.PRNGKey(1), (N2, 3), dtype=jnp.float32)
    p2 = jax.block_until_ready(irtnet_forward(x2))
    z2, a2, b2 = x2[:, 0], x2[:, 1], x2[:, 2]
    p2_ref = 1.0 / (1.0 + jnp.exp(-a2 * (z2 - b2)))
    assert p2.shape == (N2,)
    assert jnp.allclose(p2, p2_ref, atol=1e-6, rtol=1e-5)

    print("KERNEL_OK")
</pallas_src>

<mosaic_0001>
module attributes {stable_mosaic.version = 11 : i64} {
  func.func @_irt_kernel(%arg0: i32, %arg1: memref<3x8x128xf32, #tpu.memory_space<vmem>>, %arg2: memref<8x128xf32, #tpu.memory_space<vmem>>) attributes {dimension_semantics = [#tpu.dimension_semantics<parallel>], iteration_bounds = array<i64: 1>, scalar_prefetch = 0 : i64, scratch_operands = 0 : i64, tpu.core_type = #tpu.core_type<tc>, window_params = [{transform_indices = @transform_0, window_bounds = array<i64: 3, 8, 128>}, {transform_indices = @transform_1, window_bounds = array<i64: 8, 128>}]} {
    %c0 = arith.constant 0 : index
    %c0_0 = arith.constant 0 : index
    %c0_1 = arith.constant 0 : index
    %0 = vector.load %arg1[%c0, %c0_0, %c0_1] : memref<3x8x128xf32, #tpu.memory_space<vmem>>, vector<1x8x128xf32>
    %1 = vector.shape_cast %0 : vector<1x8x128xf32> to vector<8x128xf32>
    %c1 = arith.constant 1 : index
    %c0_2 = arith.constant 0 : index
    %c0_3 = arith.constant 0 : index
    %2 = vector.load %arg1[%c1, %c0_2, %c0_3] : memref<3x8x128xf32, #tpu.memory_space<vmem>>, vector<1x8x128xf32>
    %3 = vector.shape_cast %2 : vector<1x8x128xf32> to vector<8x128xf32>
    %c2 = arith.constant 2 : index
    %c0_4 = arith.constant 0 : index
    %c0_5 = arith.constant 0 : index
    %4 = vector.load %arg1[%c2, %c0_4, %c0_5] : memref<3x8x128xf32, #tpu.memory_space<vmem>>, vector<1x8x128xf32>
    %5 = vector.shape_cast %4 : vector<1x8x128xf32> to vector<8x128xf32>
    %6 = arith.subf %1, %5 : vector<8x128xf32>
    %7 = arith.mulf %3, %6 : vector<8x128xf32>
    %8 = arith.negf %7 : vector<8x128xf32>
    %9 = math.exp %8 : vector<8x128xf32>
    %cst = arith.constant 1.000000e+00 : f32
    %10 = vector.broadcast %cst : f32 to vector<8x128xf32>
    %11 = arith.addf %10, %9 : vector<8x128xf32>
    %12 = arith.divf %10, %11 : vector<8x128xf32>
    %c0_6 = arith.constant 0 : index
    %c0_7 = arith.constant 0 : index
    %13 = vector.load %arg2[%c0_6, %c0_7] : memref<8x128xf32, #tpu.memory_space<vmem>>, vector<8x128xf32>
    tpu.vector_store %arg2[%c0_6, %c0_7], %12 {strides = array<i32>} : memref<8x128xf32, #tpu.memory_space<vmem>>, vector<8x128xf32>,
    return
  }
  func.func @transform_0(%arg0: i32) -> (i32, i32, i32) {
    %c0_i32 = arith.constant 0 : i32
    %c0_i32_0 = arith.constant 0 : i32
    %c0_i32_1 = arith.constant 0 : i32
    return %c0_i32, %arg0, %c0_i32_0 : i32, i32, i32
  }
  func.func @transform_1(%arg0: i32) -> (i32, i32) {
    %c0_i32 = arith.constant 0 : i32
    %c0_i32_0 = arith.constant 0 : i32
    return %arg0, %c0_i32 : i32, i32
  }
}

</mosaic_0001>

<bundles_post_ra>
// kernel: irtnet_forward.1
= control target key start
LH: loop header
LB: loop body
LE: loop exit
PB: predicated region body
PF: predicated region fallthrough
CT: control target
= control target key end

     0   :  { %s68_s0 = inlined_call_operand.vmem [shape: f32[3,8,128], index: 0, kind: input, shape index: {}]   ;;  %s69_s1 = inlined_call_operand.vmem [shape: f32[8,128], index: 1, kind: output, shape index: {}]  }
   0x1   :  { %v8_v0 = vld [vmem:[%s68_s0] sm:$0xff]  ;;  %v39_v1 = vld [vmem:[%s68_s0 + $0x8] sm:$0xff]  ;;  %v40_v2 = vld [vmem:[%s68_s0 + $0x10] sm:$0xff] }
   0x2   :  { %v13_v3 = vsub.f32 %v8_v0, %v40_v2 }
   0x4   :  { %v14_v4 = vmul.f32 %v39_v1, %v13_v3 }
   0x6   :  { %v41_v5 = vmul.f32 -1.442695, %v14_v4 }
   0x8   :  { %42 = vpow2.f32 %v41_v5 }
   0xe   :  { %v43_v6 = vpop.eup %42 }
   0xf   :  { %v18_v7 = vadd.f32 1.0, %v43_v6 }
  0x11   :  { %44 = vrcp.f32 %v18_v7  ;;  %v30_v10 = vand.u32 2147483648, %v18_v7  ;;  %vm24_vm0 = vweird.f32 %v18_v7  ;;  %v28_v12 = vand.u32 2147483647, %v18_v7 }
  0x13   :  { %v31_v14 = vor.u32 1.1754944e-38, %v30_v10  ;;  %vm29_vm3 = vcmp.eq.f32.partialorder %v28_v12, 8.507059e+37 }
  0x17   :  { %v45_v8 = vpop.eup %44 }
  0x18   :  { %v20_v9 = vmul.f32 %v45_v8, %v18_v7  ;;  %vm25_vm1 = vweird.f32 %v45_v8 }
  0x19   :  { %vm26_vm2 = vmor %vm24_vm0, %vm25_vm1 }
  0x1a   :  { %v21_v11 = vsub.f32 1.0, %v20_v9 }
  0x1c   :  { %v22_v13 = vmul.f32 %v45_v8, %v21_v11 }
  0x1e   :  { %v23_v15 = vadd.f32 %v45_v8, %v22_v13 }
  0x20   :  { %v27_v16 = vsel %vm26_vm2, %v45_v8, %v23_v15 }
  0x21   :  { %v32_v17 = vsel %vm29_vm3, %v31_v14, %v27_v16 }
  0x22   :  { %34 = vst [vmem:[%s69_s1] sm:$0xff] %v32_v17 }

</bundles_post_ra>
